<compile_context>
chip_gen: v7x
topology: tpu7x:2x2x1
jax: 0.10.0
libtpu: 0.0.40
codegen_flags: <defaults>
</compile_context>

<pallas_src>
import functools

import jax
import jax.numpy as jnp
from jax.experimental import pallas as pl
from jax.experimental.pallas import tpu as pltpu


LANE = 128          # lane-dense padding target for hidden/output compute
SMALL_BATCH = 512   # <= this: single full-extent block (fast path)


def _round_up(x, m):
    return ((x + m - 1) // m) * m


def dqn_kernel(x_ref, w1_ref, b1_ref, w2_ref, b2_ref, w3_ref, b3_ref, o_ref):
    # fc1 + ReLU: in-kernel bf16 cast of x (free on VPU), f32 MXU accumulation.
    x = x_ref[...].astype(jnp.bfloat16)
    h1 = jnp.dot(x, w1_ref[...], preferred_element_type=jnp.float32)
    h1 = jnp.maximum(h1 + b1_ref[...], 0.0).astype(jnp.bfloat16)

    # fc2 + ReLU (lane-dense: hidden-64 padded to 128 with zeros).
    h2 = jnp.dot(h1, w2_ref[...], preferred_element_type=jnp.float32)
    h2 = jnp.maximum(h2 + b2_ref[...], 0.0)

    # fc3 in f32 (value head kept at full precision; tiny K, cheap on the MXU).
    out = jnp.dot(h2, w3_ref[...], preferred_element_type=jnp.float32)
    out = out + b3_ref[...]

    # Store only the real (unpadded) output lanes -> small HBM writeback.
    o_ref[...] = out[:, : o_ref.shape[1]].astype(o_ref.dtype)


def pad_and_cast_params(raw_params):
    """fc1/fc2 weights -> bf16, fc3 kept f32; hidden-64 / output dims are
    zero-padded to 128 lanes so all in-VMEM compute is lane-dense."""
    w1, b1, w2, b2, w3, b3 = raw_params
    h2 = w2.shape[1]
    out_size = w3.shape[1]
    h2_p = _round_up(h2, LANE)
    out_p = _round_up(out_size, LANE)

    w2p = jnp.pad(w2, ((0, 0), (0, h2_p - h2)))
    b2p = jnp.pad(b2, ((0, 0), (0, h2_p - h2)))
    w3p = jnp.pad(w3, ((0, h2_p - h2), (0, out_p - out_size)))
    b3p = jnp.pad(b3, ((0, 0), (0, out_p - out_size)))

    return (
        w1.astype(jnp.bfloat16), b1.astype(jnp.float32),
        w2p.astype(jnp.bfloat16), b2p.astype(jnp.float32),
        w3p.astype(jnp.float32), b3p.astype(jnp.float32),
    )


def _choose_tile_b(B, tile_b):
    """Batch tile: full-extent single block for small B; otherwise a multiple
    of 8 capped so the grid has >= 2 steps (v7x megacore gets both TCs busy)."""
    if B <= SMALL_BATCH:
        return B
    half = _round_up((B + 1) // 2, 8)
    tb = min(tile_b, half)
    return max(8, (tb // 8) * 8)


@functools.partial(jax.jit, static_argnums=(2, 3))
def dqn_forward(x, padded_params, out_size, tile_b=1024):
    """x: (B, in_features) f32 (or bf16).  padded_params from pad_and_cast_params."""
    w1, b1, w2, b2, w3, b3 = padded_params
    B, in_features = x.shape

    tb = _choose_tile_b(B, tile_b)
    grid = (pl.cdiv(B, tb),)   # ragged last block handled by Pallas (masked writes)

    H1 = w1.shape[1]
    H2P = w2.shape[1]
    OUTP = w3.shape[1]
    flops = 2 * B * (in_features * H1 + H1 * H2P + H2P * OUTP)
    bytes_accessed = (
        B * in_features * x.dtype.itemsize          # x (stays f32 in HBM)
        + (w1.size + w2.size) * 2                   # bf16 fc1/fc2 weights
        + w3.size * 4                               # f32 fc3 weights
        + (b1.size + b2.size + b3.size) * 4         # f32 biases
        + B * out_size * 4                          # unpadded f32 output
    )

    return pl.pallas_call(
        dqn_kernel,
        out_shape=jax.ShapeDtypeStruct((B, out_size), jnp.float32),
        grid=grid,
        in_specs=[
            # x tiles pipeline over the batch grid (f32 in HBM, cast in-kernel).
            pl.BlockSpec((tb, in_features), lambda i: (i, 0)),
            # Weights / biases: constant index_map -> VMEM-resident, no re-DMA.
            pl.BlockSpec(w1.shape, lambda i: (0, 0)),
            pl.BlockSpec(b1.shape, lambda i: (0, 0)),
            pl.BlockSpec(w2.shape, lambda i: (0, 0)),
            pl.BlockSpec(b2.shape, lambda i: (0, 0)),
            pl.BlockSpec(w3.shape, lambda i: (0, 0)),
            pl.BlockSpec(b3.shape, lambda i: (0, 0)),
        ],
        # Unpadded output: full-extent last dim (out_size), tb-row batch tiles.
        out_specs=pl.BlockSpec((tb, out_size), lambda i: (i, 0)),
        compiler_params=pltpu.CompilerParams(
            dimension_semantics=("parallel",),
        ),
        cost_estimate=pl.CostEstimate(
            flops=flops, transcendentals=0, bytes_accessed=bytes_accessed),
    )(x, w1, b1, w2, b2, w3, b3)


def init_dqn_params(key, input_size, output_size):
    """Deterministic init matching PyTorch nn.Linear default (uniform +/- 1/sqrt(fan_in)).
    Weights stored (in_features, out_features)."""
    def linear(k, fan_in, fan_out):
        kw, kb = jax.random.split(k)
        bound = 1.0 / jnp.sqrt(fan_in)
        w = jax.random.uniform(kw, (fan_in, fan_out), jnp.float32, -bound, bound)
        b = jax.random.uniform(kb, (1, fan_out), jnp.float32, -bound, bound)
        return w, b

    k1, k2, k3 = jax.random.split(key, 3)
    w1, b1 = linear(k1, input_size, 128)
    w2, b2 = linear(k2, 128, 64)
    w3, b3 = linear(k3, 64, output_size)
    return (w1, b1, w2, b2, w3, b3)


if __name__ == "__main__":
    key = jax.random.PRNGKey(0)
    k_x, k_p, k_x2 = jax.random.split(key, 3)

    input_size = 16   # flat state vector
    output_size = 4   # number of actions

    raw_params = init_dqn_params(k_p, input_size, output_size)
    params = pad_and_cast_params(raw_params)
    w1, b1, w2, b2, w3, b3 = raw_params

    def ref_fwd(xx):
        h = jnp.maximum(xx @ w1 + b1, 0.0)
        h = jnp.maximum(h @ w2 + b2, 0.0)
        return h @ w3 + b3

    # 1) Small-batch fast path (single full-extent block).
    x_small = jax.random.normal(k_x, (2, input_size), jnp.float32)
    out_small = dqn_forward(x_small, params, output_size)
    jax.block_until_ready(out_small)
    assert out_small.shape == (2, output_size)
    assert jnp.allclose(out_small, ref_fwd(x_small), atol=3e-2, rtol=3e-2)

    # 2) Tiled path with a ragged last block (grid of 3 x 256-row tiles on B=640).
    x_big = jax.random.normal(k_x2, (640, input_size), jnp.float32)
    out_big = dqn_forward(x_big, params, output_size, 256)
    jax.block_until_ready(out_big)
    assert out_big.shape == (640, output_size)
    assert jnp.allclose(out_big, ref_fwd(x_big), atol=3e-2, rtol=3e-2)

    print("KERNEL_OK")
</pallas_src>

<mosaic_0001>
module attributes {stable_mosaic.version = 11 : i64} {
  func.func @dqn_kernel(%arg0: i32, %arg1: memref<2x16xf32, #tpu.memory_space<vmem>>, %arg2: memref<16x128xbf16, #tpu.memory_space<vmem>>, %arg3: memref<1x128xf32, #tpu.memory_space<vmem>>, %arg4: memref<128x128xbf16, #tpu.memory_space<vmem>>, %arg5: memref<1x128xf32, #tpu.memory_space<vmem>>, %arg6: memref<128x128xf32, #tpu.memory_space<vmem>>, %arg7: memref<1x128xf32, #tpu.memory_space<vmem>>, %arg8: memref<2x4xf32, #tpu.memory_space<vmem>>) attributes {dimension_semantics = [#tpu.dimension_semantics<parallel>], iteration_bounds = array<i64: 1>, scalar_prefetch = 0 : i64, scratch_operands = 0 : i64, tpu.core_type = #tpu.core_type<tc>, window_params = [{transform_indices = @transform_0, window_bounds = array<i64: 2, 16>}, {pipeline_mode = #tpu.pipeline_mode<synchronous>, transform_indices = @transform_1, window_bounds = array<i64: 16, 128>}, {pipeline_mode = #tpu.pipeline_mode<synchronous>, transform_indices = @transform_2, window_bounds = array<i64: 1, 128>}, {pipeline_mode = #tpu.pipeline_mode<synchronous>, transform_indices = @transform_3, window_bounds = array<i64: 128, 128>}, {pipeline_mode = #tpu.pipeline_mode<synchronous>, transform_indices = @transform_4, window_bounds = array<i64: 1, 128>}, {pipeline_mode = #tpu.pipeline_mode<synchronous>, transform_indices = @transform_5, window_bounds = array<i64: 128, 128>}, {pipeline_mode = #tpu.pipeline_mode<synchronous>, transform_indices = @transform_6, window_bounds = array<i64: 1, 128>}, {transform_indices = @transform_7, window_bounds = array<i64: 2, 4>}]} {
    %c0 = arith.constant 0 : index
    %c0_0 = arith.constant 0 : index
    %0 = vector.load %arg1[%c0, %c0_0] : memref<2x16xf32, #tpu.memory_space<vmem>>, vector<2x16xf32>
    %1 = arith.truncf %0 : vector<2x16xf32> to vector<2x16xbf16>
    %c0_1 = arith.constant 0 : index
    %c0_2 = arith.constant 0 : index
    %2 = vector.load %arg2[%c0_1, %c0_2] : memref<16x128xbf16, #tpu.memory_space<vmem>>, vector<16x128xbf16>
    %cst = arith.constant dense<0.000000e+00> : vector<2x128xf32>
    %3 = tpu.matmul %1, %2, %cst {dimension_numbers = #tpu.dot_dimension_numbers<[1], [0], [0], [1], [0, 0, 1, 1], [], []>} : vector<2x16xbf16>, vector<16x128xbf16>, vector<2x128xf32> -> vector<2x128xf32>
    %c0_3 = arith.constant 0 : index
    %c0_4 = arith.constant 0 : index
    %4 = vector.load %arg3[%c0_3, %c0_4] : memref<1x128xf32, #tpu.memory_space<vmem>>, vector<1x128xf32>
    %5 = vector.broadcast %4 : vector<1x128xf32> to vector<2x128xf32>
    %6 = arith.addf %3, %5 : vector<2x128xf32>
    %cst_5 = arith.constant 0.000000e+00 : f32
    %7 = vector.broadcast %cst_5 : f32 to vector<2x128xf32>
    %8 = arith.maximumf %6, %7 : vector<2x128xf32>
    %9 = arith.truncf %8 : vector<2x128xf32> to vector<2x128xbf16>
    %c0_6 = arith.constant 0 : index
    %c0_7 = arith.constant 0 : index
    %10 = vector.load %arg4[%c0_6, %c0_7] : memref<128x128xbf16, #tpu.memory_space<vmem>>, vector<128x128xbf16>
    %cst_8 = arith.constant dense<0.000000e+00> : vector<2x128xf32>
    %11 = tpu.matmul %9, %10, %cst_8 {dimension_numbers = #tpu.dot_dimension_numbers<[1], [0], [0], [1], [0, 0, 1, 1], [], []>} : vector<2x128xbf16>, vector<128x128xbf16>, vector<2x128xf32> -> vector<2x128xf32>
    %c0_9 = arith.constant 0 : index
    %c0_10 = arith.constant 0 : index
    %12 = vector.load %arg5[%c0_9, %c0_10] : memref<1x128xf32, #tpu.memory_space<vmem>>, vector<1x128xf32>
    %13 = vector.broadcast %12 : vector<1x128xf32> to vector<2x128xf32>
    %14 = arith.addf %11, %13 : vector<2x128xf32>
    %cst_11 = arith.constant 0.000000e+00 : f32
    %15 = vector.broadcast %cst_11 : f32 to vector<2x128xf32>
    %16 = arith.maximumf %14, %15 : vector<2x128xf32>
    %c0_12 = arith.constant 0 : index
    %c0_13 = arith.constant 0 : index
    %17 = vector.load %arg6[%c0_12, %c0_13] : memref<128x128xf32, #tpu.memory_space<vmem>>, vector<128x128xf32>
    %cst_14 = arith.constant dense<0.000000e+00> : vector<2x128xf32>
    %18 = tpu.matmul %16, %17, %cst_14 {dimension_numbers = #tpu.dot_dimension_numbers<[1], [0], [0], [1], [0, 0, 1, 1], [], []>} : vector<2x128xf32>, vector<128x128xf32>, vector<2x128xf32> -> vector<2x128xf32>
    %c0_15 = arith.constant 0 : index
    %c0_16 = arith.constant 0 : index
    %19 = vector.load %arg7[%c0_15, %c0_16] : memref<1x128xf32, #tpu.memory_space<vmem>>, vector<1x128xf32>
    %20 = vector.broadcast %19 : vector<1x128xf32> to vector<2x128xf32>
    %21 = arith.addf %18, %20 : vector<2x128xf32>
    %22 = vector.extract_strided_slice %21 {offsets = [0, 0], sizes = [2, 4], strides = [1, 1]} : vector<2x128xf32> to vector<2x4xf32>
    %c0_17 = arith.constant 0 : index
    %c0_18 = arith.constant 0 : index
    %23 = vector.load %arg8[%c0_17, %c0_18] : memref<2x4xf32, #tpu.memory_space<vmem>>, vector<2x4xf32>
    tpu.vector_store %arg8[%c0_17, %c0_18], %22 {strides = array<i32>} : memref<2x4xf32, #tpu.memory_space<vmem>>, vector<2x4xf32>,
    return
  }
  func.func @transform_0(%arg0: i32) -> (i32, i32) {
    %c0_i32 = arith.constant 0 : i32
    %c0_i32_0 = arith.constant 0 : i32
    return %arg0, %c0_i32 : i32, i32
  }
  func.func @transform_1(%arg0: i32) -> (i32, i32) {
    %c0_i32 = arith.constant 0 : i32
    %c0_i32_0 = arith.constant 0 : i32
    %c0_i32_1 = arith.constant 0 : i32
    return %c0_i32, %c0_i32_0 : i32, i32
  }
  func.func @transform_2(%arg0: i32) -> (i32, i32) {
    %c0_i32 = arith.constant 0 : i32
    %c0_i32_0 = arith.constant 0 : i32
    %c0_i32_1 = arith.constant 0 : i32
    return %c0_i32, %c0_i32_0 : i32, i32
  }
  func.func @transform_3(%arg0: i32) -> (i32, i32) {
    %c0_i32 = arith.constant 0 : i32
    %c0_i32_0 = arith.constant 0 : i32
    %c0_i32_1 = arith.constant 0 : i32
    return %c0_i32, %c0_i32_0 : i32, i32
  }
  func.func @transform_4(%arg0: i32) -> (i32, i32) {
    %c0_i32 = arith.constant 0 : i32
    %c0_i32_0 = arith.constant 0 : i32
    %c0_i32_1 = arith.constant 0 : i32
    return %c0_i32, %c0_i32_0 : i32, i32
  }
  func.func @transform_5(%arg0: i32) -> (i32, i32) {
    %c0_i32 = arith.constant 0 : i32
    %c0_i32_0 = arith.constant 0 : i32
    %c0_i32_1 = arith.constant 0 : i32
    return %c0_i32, %c0_i32_0 : i32, i32
  }
  func.func @transform_6(%arg0: i32) -> (i32, i32) {
    %c0_i32 = arith.constant 0 : i32
    %c0_i32_0 = arith.constant 0 : i32
    %c0_i32_1 = arith.constant 0 : i32
    return %c0_i32, %c0_i32_0 : i32, i32
  }
  func.func @transform_7(%arg0: i32) -> (i32, i32) {
    %c0_i32 = arith.constant 0 : i32
    %c0_i32_0 = arith.constant 0 : i32
    return %arg0, %c0_i32 : i32, i32
  }
}

</mosaic_0001>

<bundles_post_ra>
// kernel: dqn_forward.1
= control target key start
LH: loop header
LB: loop body
LE: loop exit
PB: predicated region body
PF: predicated region fallthrough
CT: control target
= control target key end

     0   :  { %12 = vsyncpa [#allocation3], 0  ;;  %s760_s0 = inlined_call_operand.hbm [shape: f32[2,16], index: 0, kind: input, shape index: {}]   ;;  %s761_s1 = inlined_call_operand.hbm [shape: bf16[16,128], index: 1, kind: input, shape index: {}]   ;;  %s762_s2 = inlined_call_operand.vmem [shape: f32[1,128], index: 2, kind: input, shape index: {}]   ;;  %s763_s3 = inlined_call_operand.hbm [shape: bf16[128,128], index: 3, kind: input, shape index: {}]   ;;  %s764_s4 = inlined_call_operand.vmem [shape: f32[1,128], index: 4, kind: input, shape index: {}]   ;;  %s765_s5 = inlined_call_operand.hbm [shape: f32[128,128], index: 5, kind: input, shape index: {}]   ;;  %s766_s6 = inlined_call_operand.vmem [shape: f32[1,128], index: 6, kind: input, shape index: {}]   ;;  %s767_s7 = inlined_call_operand.hbm [shape: f32[2,4], index: 7, kind: output, shape index: {}]  }
   0x1   :  { %13 = vsyncpa [#allocation6], 0 }
   0x2   :  { %14 = vsyncpa [#allocation9], 0 }
   0x3   :  { %15 = vsyncpa [#allocation4], 0  ;;  %s633_s24 = smov [#allocation5]   ;;  %s515_s28 = scalar_lea.hbm %s761_s1, 128 }
   0x4   :  { %s31_s25 = sshll.u32 %s633_s24, 4  ;;  %p516_p0 = scmp.ne.s32.totalorder %s761_s1, %s515_s28  ;;  %s32_s25 = int_to_ptr.vmem [resolvable:$true] %s31_s25 }
   0x5   :  { %p519_p1 = scmp.lt.u32.totalorder %s515_s28, %s761_s1 }
   0x7   :  { %p521_p2 = pnand %p519_p1, %p516_p0 }
   0x9   :  { %524 = shalt.err (!%p521_p2)
}
   0xa   :  { %s525_s10 = scalar_lea.vmem %s32_s25, 128  ;;  %p530_p4 = scmp.lt.s32.totalorder %s32_s25, %s32_s25 }
   0xb   :  { %p526_p3 = scmp.ne.s32.totalorder %s32_s25, %s525_s10  ;;  %p531_p5 = scmp.lt.s32.totalorder %s525_s10, %s525_s10 }
   0xd   :  { %p532_p6 = por %p531_p5, %p530_p4 }
   0xf   :  { %p533_p7 = pnand %p532_p6, %p526_p3 }
  0x11   :  { %536 = shalt.err (!%p533_p7)
}
  0x12   :  { %s634_s11 = smov 64   ;;  %s635_s12 = smov 4  }
  0x13   :  { %37 = dma.hbm_to_vmem [thread:$0]  %s761_s1, 128, %s32_s25, [#allocation6], %s634_s11, %s634_s11, %s635_s12  }
  0x14   :  { %s636_s15 = smov [#allocation2]   ;;  %s637_s17 = smov [#allocation7]  }
  0x15   :  { %s22_s16 = sshll.u32 %s636_s15, 4  ;;  %s45_s18 = sshll.u32 %s637_s17, 4  ;;  %s23_s16 = int_to_ptr.vmem [resolvable:$true] %s22_s16  ;;  %s46_s18 = int_to_ptr.vmem [resolvable:$true] %s45_s18 }
  0x16   :  { %s537_s21 = scalar_lea.hbm %s760_s0, 32 }
  0x17   :  { %p538_p8 = scmp.ne.s32.totalorder %s760_s0, %s537_s21  ;;  %p541_p9 = scmp.lt.u32.totalorder %s537_s21, %s760_s0 }
  0x19   :  { %p543_p10 = pnand %p541_p9, %p538_p8 }
  0x1b   :  { %546 = shalt.err (!%p543_p10)
}
  0x1c   :  { %s547_s1 = scalar_lea.vmem %s23_s16, 32  ;;  %p552_p12 = scmp.lt.s32.totalorder %s23_s16, %s23_s16 }
  0x1d   :  { %p548_p11 = scmp.ne.s32.totalorder %s23_s16, %s547_s1  ;;  %p553_p13 = scmp.lt.s32.totalorder %s547_s1, %s547_s1 }
  0x1f   :  { %p554_p0 = por %p553_p13, %p552_p12 }
  0x21   :  { %p555_p1 = pnand %p554_p0, %p548_p11 }
  0x23   :  { %558 = shalt.err (!%p555_p1)
}
  0x24   :  { %25 = dma.hbm_to_vmem [thread:$0]  %s760_s0, 32, %s23_s16, [#allocation3]  }
  0x25   :  { %s559_s30 = scalar_lea.hbm %s763_s3, 1024 }
  0x26   :  { %p560_p2 = scmp.ne.s32.totalorder %s763_s3, %s559_s30  ;;  %p563_p3 = scmp.lt.u32.totalorder %s559_s30, %s763_s3 }
  0x28   :  { %p565_p4 = pnand %p563_p3, %p560_p2 }
  0x2a   :  { %568 = shalt.err (!%p565_p4)
}
  0x2b   :  { %s569_s14 = scalar_lea.vmem %s46_s18, 1024  ;;  %p574_p6 = scmp.lt.s32.totalorder %s46_s18, %s46_s18 }
  0x2c   :  { %p570_p5 = scmp.ne.s32.totalorder %s46_s18, %s569_s14  ;;  %p575_p7 = scmp.lt.s32.totalorder %s569_s14, %s569_s14 }
  0x2e   :  { %p576_p8 = por %p575_p7, %p574_p6 }
  0x30   :  { %p577_p9 = pnand %p576_p8, %p570_p5 }
  0x32   :  { %580 = shalt.err (!%p577_p9)
}
  0x33   :  { %51 = dma.hbm_to_vmem [thread:$0]  %s763_s3, 1024, %s46_s18, [#allocation6], %s634_s11, %s634_s11, %s635_s12  }
  0x34   :  { %s638_s16 = smov [#allocation8]   ;;  %s581_s21 = scalar_lea.hbm %s765_s5, 2048 }
  0x35   :  { %s59_s17 = sshll.u32 %s638_s16, 4  ;;  %p582_p10 = scmp.ne.s32.totalorder %s765_s5, %s581_s21  ;;  %s60_s17 = int_to_ptr.vmem [resolvable:$true] %s59_s17 }
  0x36   :  { %p585_p11 = scmp.lt.u32.totalorder %s581_s21, %s765_s5 }
  0x38   :  { %p587_p12 = pnand %p585_p11, %p582_p10 }
  0x3a   :  { %590 = shalt.err (!%p587_p12)
}
  0x3b   :  { %s591_s1 = scalar_lea.vmem %s60_s17, 2048  ;;  %p596_p0 = scmp.lt.s32.totalorder %s60_s17, %s60_s17 }
  0x3c   :  { %p592_p13 = scmp.ne.s32.totalorder %s60_s17, %s591_s1  ;;  %p597_p1 = scmp.lt.s32.totalorder %s591_s1, %s591_s1 }
  0x3e   :  { %p598_p2 = por %p597_p1, %p596_p0 }
  0x40   :  { %p599_p3 = pnand %p598_p2, %p592_p13 }
  0x42   :  { %602 = shalt.err (!%p599_p3)
}
  0x43   :  { %s639_s3 = smov 128   ;;  %s640_s11 = smov 8  }
  0x44   :  { %65 = dma.hbm_to_vmem [thread:$0]  %s765_s5, 2048, %s60_s17, [#allocation9], %s639_s3, %s639_s3, %s640_s11  }
  0x45   :  { %625 = dma.done.wait [#allocation3], 32  }
  0x46   :  { %626 = vsyncadd [#allocation3], 4294967264 }
  0x47   :  { %627 = dma.done.wait [#allocation6], 1152  }
  0x48   :  { %628 = vsyncadd [#allocation6], 4294966144 }
  0x49   :  { %629 = dma.done.wait [#allocation9], 2048  }
  0x4a   :  { %630 = vsyncadd [#allocation9], 4294965248  ;;  %v641_v0 = vmov 0.0   ;;  %vm642_vm0 = vmmov 0   ;;  %v506_v1 = vld [vmem:[#allocation5] sm:$0xff]   ;;  %vm98_vm1 = vcmask 130048  }
  0x4b   :  { %409 = vmatprep.subr.bf16.mxu0 %v641_v0  ;;  %411 = vmatprep.mubr.msk.bf16.mxu0 %vm642_vm0, %v641_v0  ;;  %v81_v2 = vld [vmem:[#allocation2] sm:$0x3]  ;;  %v507_v4 = vld [vmem:[#allocation7] sm:$0xff]   ;;  %v508_v5 = vld [vmem:[#allocation7 + $0x8] sm:$0xff]   ;;  %v643_v15 = vmov 0.0|0.0   ;;  %s644_s30 = smov [#allocation10]  }
  0x4c   :  { %415 = vmatprep.subr.bf16.mxu1 %v641_v0  ;;  %431 = vmatprep.mubr.msk.bf16.mxu1 %vm642_vm0, %v641_v0  ;;  %v82_v3 = vpack.c.bf16 %v81_v2, %v81_v2  ;;  %v509_v6 = vld [vmem:[#allocation7 + $0x10] sm:$0xff]   ;;  %v510_v7 = vld [vmem:[#allocation7 + $0x18] sm:$0xff]   ;;  %v511_v8 = vld [vmem:[#allocation7 + $0x20] sm:$0xff]   ;;  %s357_s8 = sshll.u32 %s644_s30, 4  ;;  %vm349_vm2 = vcmask 25600   ;;  %s358_s8 = int_to_ptr.vmem [resolvable:$true] %s357_s8 }
  0x4d   :  { %410 = vmatpush3.bf16.msra.mxu0 %v506_v1  ;;  %416 = vmatpush3.bf16.msra.mxu1 %v507_v4  ;;  %v512_v9 = vld [vmem:[#allocation7 + $0x28] sm:$0xff]   ;;  %v513_v10 = vld [vmem:[#allocation7 + $0x30] sm:$0xff]   ;;  %v514_v11 = vld [vmem:[#allocation7 + $0x38] sm:$0xff]   ;;  %p608_p5 = scmp.lt.s32.totalorder %s358_s8, %s358_s8 }
  0x4e   :  { %417 = vmatprep.subr.bf16.mxu1 %v641_v0  ;;  %v256_v12 = vld [vmem:[#allocation8] sm:$0xff]  ;;  %v257_v13 = vld [vmem:[#allocation8 + $0x8] sm:$0xff]  ;;  %v258_v14 = vld [vmem:[#allocation8 + $0x10] sm:$0xff]  ;;  %470 = vmatprep.subr.bf16.mxu0 %v643_v15 }
  0x4f   :  { %v471_v16 = vpack.c.bf16 %v257_v13, %v256_v12  ;;  %v259_v17 = vld [vmem:[#allocation8 + $0x18] sm:$0xff]  ;;  %v260_v19 = vld [vmem:[#allocation8 + $0x20] sm:$0xff]  ;;  %v261_v20 = vld [vmem:[#allocation8 + $0x28] sm:$0xff] }
  0x50   :  { %412 = vmatmul.mubr.msk.bf16.vlgmr.msra.gmra.mrb[0].mxu0 %vm98_vm1, %v82_v3  ;;  %v474_v18 = vpack.c.bf16 %v259_v17, %v258_v14  ;;  %v477_v21 = vpack.c.bf16 %v261_v20, %v260_v19  ;;  %v262_v22 = vld [vmem:[#allocation8 + $0x30] sm:$0xff]  ;;  %v263_v23 = vld [vmem:[#allocation8 + $0x38] sm:$0xff]  ;;  %v264_v25 = vld [vmem:[#allocation8 + $0x40] sm:$0xff] }
  0x51   :  { %467 = vmatprep.mubr.msk.f32.mxu0 %vm642_vm0, %v641_v0  ;;  %418 = vmatpush3.bf16.msra.mxu1 %v508_v5  ;;  %v480_v24 = vpack.c.bf16 %v263_v23, %v262_v22  ;;  %v265_v26 = vld [vmem:[#allocation8 + $0x48] sm:$0xff]  ;;  %v266_v28 = vld [vmem:[#allocation8 + $0x50] sm:$0xff]  ;;  %v267_v29 = vld [vmem:[#allocation8 + $0x58] sm:$0xff] }
  0x52   :  { %419 = vmatprep.subr.bf16.mxu1 %v641_v0  ;;  %472 = vmatpush3.bf16.msra.mxu0 %v471_v16  ;;  %v483_v27 = vpack.c.bf16 %v265_v26, %v264_v25  ;;  %v486_v30 = vpack.c.bf16 %v267_v29, %v266_v28  ;;  %v268_v31 = vld [vmem:[#allocation8 + $0x60] sm:$0xff]  ;;  %v269_v32 = vld [vmem:[#allocation8 + $0x68] sm:$0xff]  ;;  %v368_v34 = vld [vmem:[%s762_s2] ss:$0 sm:$0xff] }
  0x53   :  { %473 = vmatprep.subr.bf16.mxu0 %v643_v15  ;;  %v489_v33 = vpack.c.bf16 %v269_v32, %v268_v31  ;;  %v270_v42 = vld [vmem:[#allocation8 + $0x70] sm:$0xff]  ;;  %v271_v43 = vld [vmem:[#allocation8 + $0x78] sm:$0xff] }
  0x54   :  { %v492_v44 = vpack.c.bf16 %v271_v43, %v270_v42  ;;  %v371_v45 = vld [vmem:[%s764_s4] ss:$0 sm:$0xff]  ;;  %s603_s4 = scalar_lea.vmem %s358_s8, 32 }
  0x55   :  { %420 = vmatpush3.bf16.msra.mxu1 %v509_v6  ;;  %v380_v52 = vld [vmem:[%s766_s6] ss:$0 sm:$0xff]  ;;  %p604_p4 = scmp.ne.s32.totalorder %s358_s8, %s603_s4  ;;  %p609_p6 = scmp.lt.s32.totalorder %s603_s4, %s603_s4 }
  0x56   :  { %421 = vmatprep.subr.bf16.mxu1 %v641_v0  ;;  %475 = vmatpush3.bf16.msra.mxu0 %v474_v18 }
  0x57   :  { %476 = vmatprep.subr.bf16.mxu0 %v643_v15  ;;  %p610_p7 = por %p609_p6, %p608_p5 }
  0x59   :  { %422 = vmatpush3.bf16.msra.mxu1 %v510_v7  ;;  %p611_p8 = pnand %p610_p7, %p604_p4 }
  0x5a   :  { %423 = vmatprep.subr.bf16.mxu1 %v641_v0  ;;  %478 = vmatpush3.bf16.msra.mxu0 %v477_v21 }
  0x5b   :  { %479 = vmatprep.subr.bf16.mxu0 %v643_v15 }
  0x5d   :  { %424 = vmatpush3.bf16.msra.mxu1 %v511_v8 }
  0x5e   :  { %425 = vmatprep.subr.bf16.mxu1 %v641_v0  ;;  %481 = vmatpush3.bf16.msra.mxu0 %v480_v24 }
  0x5f   :  { %482 = vmatprep.subr.bf16.mxu0 %v643_v15 }
  0x61   :  { %426 = vmatpush3.bf16.msra.mxu1 %v512_v9 }
  0x62   :  { %427 = vmatprep.subr.bf16.mxu1 %v641_v0  ;;  %484 = vmatpush3.bf16.msra.mxu0 %v483_v27 }
  0x63   :  { %485 = vmatprep.subr.bf16.mxu0 %v643_v15 }
  0x65   :  { %428 = vmatpush3.bf16.msra.mxu1 %v513_v10 }
  0x66   :  { %429 = vmatprep.subr.bf16.mxu1 %v641_v0  ;;  %487 = vmatpush3.bf16.msra.mxu0 %v486_v30 }
  0x67   :  { %488 = vmatprep.subr.bf16.mxu0 %v643_v15 }
  0x69   :  { %430 = vmatpush3.bf16.msra.mxu1 %v514_v11 }
  0x6a   :  { %490 = vmatpush3.bf16.msra.mxu0 %v489_v33 }
  0x6b   :  { %491 = vmatprep.subr.bf16.mxu0 %v643_v15 }
  0x6e   :  { %493 = vmatpush3.bf16.msra.mxu0 %v492_v44 }
 0x123   :  { %v136_v35 = vpop.f32.mrb[0].mxu0 }
 0x124   :  { %v137_v36 = vadd.f32 %v368_v34, %v136_v35  ;;  %v413_v37 = vpop.f32.mrb[1].mxu0 }
 0x125   :  { %v139_v38 = vpop.f32.mrb[2].mxu0 }
 0x126   :  { %v142_v39 = vmax.f32 %v137_v36, 0.0  ;;  %v414_v40 = vpop.f32.mrb[3].mxu0 }
 0x128   :  { %v143_v41 = vpack.c.bf16 %v142_v39, %v142_v39 }
 0x12a   :  { %432 = vmatmul.mubr.bf16.vlgmr.msra.gmra.mrb[0].mxu1 %v143_v41 }
 0x1fd   :  { %v249_v46 = vpop.f32.mrb[0].mxu1 }
 0x1fe   :  { %v250_v47 = vadd.f32 %v371_v45, %v249_v46  ;;  %v433_v48 = vpop.f32.mrb[1].mxu1 }
 0x1ff   :  { %v252_v49 = vpop.f32.mrb[2].mxu1 }
 0x200   :  { %v255_v50 = vmax.f32 %v250_v47, 0.0  ;;  %v434_v51 = vpop.f32.mrb[3].mxu1 }
 0x202   :  { %468 = vmatmul.mubr.f32.vlgmr.msra.gmra.mrb[4].mxu0 %v255_v50 }
 0x2d5   :  { %v345_v53 = vpop.f32.mrb[4].mxu0 }
 0x2d6   :  { %v346_v54 = vadd.f32 %v380_v52, %v345_v53  ;;  %v469_v55 = vpop.f32.mrb[5].mxu0 }
 0x2d8   :  { %350 = vst.msk [vmem:[#allocation10] sm:$0x3] %vm349_vm2, %v346_v54 }
 0x2d9   :  { %614 = shalt.err (!%p611_p8)
}
 0x2da   :  { %s615_s13 = scalar_lea.hbm %s767_s7, 32 }
 0x2db   :  { %p616_p9 = scmp.ne.s32.totalorder %s767_s7, %s615_s13  ;;  %p619_p10 = scmp.lt.u32.totalorder %s615_s13, %s767_s7 }
 0x2dd   :  { %p621_p11 = pnand %p619_p10, %p616_p9 }
 0x2df   :  { %624 = shalt.err (!%p621_p11)
}
 0x2e0   :  { %360 = dma.vmem_to_hbm [thread:$0]  %s358_s8, 32, %s767_s7, [#allocation4]  }
 0x2e1   :  { %631 = dma.done.wait [#allocation4], 32  }
 0x2e2   :  { %632 = vsyncadd [#allocation4], 4294967264 }
 0x2e3   :  { %364 = vsyncpa [#allocation3], 1 }
 0x2e4   :  { %365 = vsyncpa [#allocation6], 1 }
 0x2e5   :  { %366 = vsyncpa [#allocation9], 1 }
 0x2e6   :  { %367 = vsyncpa [#allocation4], 1 }

</bundles_post_ra>
